<compile_context>
chip_gen: v7x
topology: tpu7x:2x2x1
jax: 0.10.0
libtpu: 0.0.40
codegen_flags: <defaults>
</compile_context>

<pallas_src>
import functools

import jax
import jax.numpy as jnp
from jax import lax
from jax.experimental import pallas as pl
from jax.experimental.pallas import tpu as pltpu

EPS = 1e-5


# ----------------------------- Pallas kernels ------------------------------

def _bn_stats_kernel(x_ref, s_ref, q_ref):
    """Per-image partial sum / sum-of-squares; per-channel combine happens in the wrapper."""
    xb = x_ref[0].astype(jnp.float32)                    # (H, W*Cin)
    s_ref[0] = jnp.sum(xb, axis=0, keepdims=True)        # (1, W*Cin)
    q_ref[0] = jnp.sum(xb * xb, axis=0, keepdims=True)


def _fused_conv_kernel(x_ref, s1_ref, b1_ref, wk_ref, z_ref, ps_ref, pq_ref, xpad_ref,
                       *, H, KH, OH, pad, stride, compute_dtype):
    """BN1 affine + zero pad (VMEM) + conv as Toeplitz matmuls (bf16 MXU) + BN2 partial stats.

    x_ref   : (1, H, W*Cin)         raw image, channels-last, W folded into lanes
    s1_ref  : (1, W*Cin)            BN1 scale tiled along W
    b1_ref  : (1, W*Cin)            BN1 shift tiled along W
    wk_ref  : (KH, W*Cin, OW*Cout)  Toeplitz-expanded conv weight (resident, compute_dtype)
    z_ref   : (1, OH, OW*Cout)      conv output tile (f32, lane dense)
    ps_ref  : (1, 1, OW*Cout)       per-image partial sum of z    (for BN2 stats)
    pq_ref  : (1, 1, OW*Cout)       per-image partial sum of z^2  (for BN2 stats)
    xpad_ref: (H + 2*pad, W*Cin)    f32 VMEM scratch; height-padded, BN1-normalized image
                                    (width padding is folded into the Toeplitz weight)
    """
    # BN1 affine (batch statistics), written into the zero-initialized scratch interior.
    xbn = x_ref[0].astype(jnp.float32) * s1_ref[...] + b1_ref[...]
    xpad_ref[...] = jnp.zeros_like(xpad_ref)
    xpad_ref[pl.ds(pad, H), :] = xbn

    # Conv = sum over kh of (rows oh*stride+kh of padded image) @ (W*Cin, OW*Cout) weight slab.
    # Operands in compute_dtype (bf16) on the MXU, accumulation in f32.
    acc = jnp.zeros(z_ref.shape[1:], jnp.float32)        # (OH, OW*Cout)
    for kh in range(KH):
        rows = pl.ds(kh, OH) if stride == 1 else pl.ds(kh, OH, stride)
        a = xpad_ref[rows, :].astype(compute_dtype)
        acc = acc + jnp.dot(a, wk_ref[kh], preferred_element_type=jnp.float32)

    z_ref[0] = acc
    # BN2 partial statistics ride along for free (sublane reduce; VPU/XLU slots idle vs MXU).
    ps_ref[0] = jnp.sum(acc, axis=0, keepdims=True)
    pq_ref[0] = jnp.sum(acc * acc, axis=0, keepdims=True)


def _bn_relu_kernel(z_ref, s_ref, b_ref, o_ref):
    """y = relu(z * scale + shift), scale/shift per channel tiled along OW (lane dense)."""
    y = z_ref[...] * s_ref[...] + b_ref[...]
    o_ref[...] = jnp.maximum(y, 0.0)


# ----------------------------- wrapper helpers ------------------------------

def _toeplitz_weight(w_oihw, W, OW, stride, pad, dtype):
    """Expand (Cout, Cin, KH, KW) -> (KH, W*Cin, OW*Cout) so conv row-slabs become plain matmuls.

    Width zero-padding is folded in: positions with ow*stride + kw - pad outside [0, W) simply get
    no weight entry. Weights are rounded to `dtype` (bf16) *before* expansion so the kernel matches
    a bf16-rounded reference (the 0/1 scatter itself is exact).
    """
    _, Cin, KH, KW = w_oihw.shape
    Cout = w_oihw.shape[0]
    w_hwio = jnp.transpose(w_oihw, (2, 3, 1, 0)).astype(dtype).astype(jnp.float32)
    wp = jnp.arange(W)
    ow = jnp.arange(OW)
    kw = jnp.arange(KW)
    sel = (wp[None, :, None] == (ow[None, None, :] * stride + kw[:, None, None] - pad))
    sel = sel.astype(jnp.float32)                                    # (KW, W, OW)
    wk = jnp.einsum("xpo,hxcd->hpcod", sel, w_hwio)                  # (KH, W, Cin, OW, Cout)
    return wk.reshape(KH, W * Cin, OW * Cout).astype(dtype)


# ----------------------------- CNNBlock forward ------------------------------

def cnn_block_forward(x_nchw, params, *, stride, padding, compute_dtype=jnp.bfloat16):
    w = params["conv_w"]                       # (Cout, Cin, KH, KW) — PyTorch OIHW
    g1, b1 = params["bn1_gamma"], params["bn1_beta"]
    g2, b2 = params["bn2_gamma"], params["bn2_beta"]

    N, Cin, H, W = x_nchw.shape
    Cout, _, KH, KW = w.shape
    OH = (H + 2 * padding - KH) // stride + 1
    OW = (W + 2 * padding - KW) // stride + 1
    Hp = H + 2 * padding
    WC, OWC = W * Cin, OW * Cout

    # Single boundary transpose to channels-last (NCHW API preserved; glue, not a Pallas pass).
    x_rows = jnp.transpose(x_nchw, (0, 2, 3, 1)).astype(jnp.float32).reshape(N, H, WC)

    # ---- Pass 1: BN1 batch statistics (per-image partials, parallel grid; combined in JAX) ----
    ps1, pq1 = pl.pallas_call(
        _bn_stats_kernel,
        out_shape=(jax.ShapeDtypeStruct((N, 1, WC), jnp.float32),
                   jax.ShapeDtypeStruct((N, 1, WC), jnp.float32)),
        grid=(N,),
        in_specs=[pl.BlockSpec((1, H, WC), lambda n: (n, 0, 0))],
        out_specs=(pl.BlockSpec((1, 1, WC), lambda n: (n, 0, 0)),
                   pl.BlockSpec((1, 1, WC), lambda n: (n, 0, 0))),
        compiler_params=pltpu.CompilerParams(dimension_semantics=("parallel",)),
    )(x_rows)
    cnt1 = N * H * W
    s1 = ps1.reshape(N, W, Cin).sum(axis=(0, 1))
    q1 = pq1.reshape(N, W, Cin).sum(axis=(0, 1))
    mean1 = s1 / cnt1
    # NOTE: E[x^2]-E[x]^2 in f32 — fine for roughly-centered activations; switch to a two-pass
    # formulation if |mean| >> std.
    var1 = q1 / cnt1 - mean1 * mean1
    scale1 = g1 / jnp.sqrt(var1 + EPS)
    shift1 = b1 - mean1 * scale1
    s1_t = jnp.tile(scale1, W).reshape(1, WC)
    b1_t = jnp.tile(shift1, W).reshape(1, WC)

    # ---- Pass 2: fused BN1-affine + pad + conv (bf16 MXU) + BN2 partial stats + lane-dense z ----
    wk = _toeplitz_weight(w, W, OW, stride, padding, compute_dtype)   # (KH, WC, OWC)
    conv_kernel = functools.partial(
        _fused_conv_kernel, H=H, KH=KH, OH=OH, pad=padding, stride=stride,
        compute_dtype=compute_dtype)
    z3, ps2, pq2 = pl.pallas_call(
        conv_kernel,
        out_shape=(jax.ShapeDtypeStruct((N, OH, OWC), jnp.float32),
                   jax.ShapeDtypeStruct((N, 1, OWC), jnp.float32),
                   jax.ShapeDtypeStruct((N, 1, OWC), jnp.float32)),
        grid=(N,),
        in_specs=[
            pl.BlockSpec((1, H, WC), lambda n: (n, 0, 0)),
            pl.BlockSpec((1, WC), lambda n: (0, 0)),
            pl.BlockSpec((1, WC), lambda n: (0, 0)),
            pl.BlockSpec((KH, WC, OWC), lambda n: (0, 0, 0)),   # weight stays resident in VMEM
        ],
        out_specs=(
            pl.BlockSpec((1, OH, OWC), lambda n: (n, 0, 0)),
            pl.BlockSpec((1, 1, OWC), lambda n: (n, 0, 0)),
            pl.BlockSpec((1, 1, OWC), lambda n: (n, 0, 0)),
        ),
        scratch_shapes=[pltpu.VMEM((Hp, WC), jnp.float32)],
        compiler_params=pltpu.CompilerParams(dimension_semantics=("parallel",)),
    )(x_rows, s1_t, b1_t, wk)

    # ---- BN2 statistics straight from the fused partials (z is never re-read for stats) ----
    cnt2 = N * OH * OW
    s2 = ps2.reshape(N, OW, Cout).sum(axis=(0, 1))
    q2 = pq2.reshape(N, OW, Cout).sum(axis=(0, 1))
    mean2 = s2 / cnt2
    var2 = q2 / cnt2 - mean2 * mean2
    scale2 = g2 / jnp.sqrt(var2 + EPS)
    shift2 = b2 - mean2 * scale2
    s2_t = jnp.tile(scale2, OW).reshape(1, 1, OWC)
    b2_t = jnp.tile(shift2, OW).reshape(1, 1, OWC)

    # ---- Pass 3: BN2 affine + ReLU (lane-dense streaming, parallel over images) ----
    out3 = pl.pallas_call(
        _bn_relu_kernel,
        out_shape=jax.ShapeDtypeStruct((N, OH, OWC), jnp.float32),
        grid=(N,),
        in_specs=[pl.BlockSpec((1, OH, OWC), lambda n: (n, 0, 0)),
                  pl.BlockSpec((1, 1, OWC), lambda n: (0, 0, 0)),
                  pl.BlockSpec((1, 1, OWC), lambda n: (0, 0, 0))],
        out_specs=pl.BlockSpec((1, OH, OWC), lambda n: (n, 0, 0)),
        compiler_params=pltpu.CompilerParams(dimension_semantics=("parallel",)),
    )(z3, s2_t, b2_t)

    # Back to the module's NCHW interface (boundary glue; avoidable for an NHWC-native caller).
    return out3.reshape(N, OH, OW, Cout).transpose(0, 3, 1, 2)


# ----------------------------- pure-JAX reference ------------------------------

def cnn_block_reference(x, params, *, stride, padding, conv_dtype=jnp.float32):
    w = params["conv_w"]
    g1, b1 = params["bn1_gamma"], params["bn1_beta"]
    g2, b2 = params["bn2_gamma"], params["bn2_beta"]

    m1 = x.mean(axis=(0, 2, 3))
    v1 = x.var(axis=(0, 2, 3))
    xh = (x - m1[None, :, None, None]) / jnp.sqrt(v1 + EPS)[None, :, None, None]
    xh = xh * g1[None, :, None, None] + b1[None, :, None, None]

    if conv_dtype != jnp.float32:   # emulate the kernel's low-precision MXU operands
        xh = xh.astype(conv_dtype).astype(jnp.float32)
        w = w.astype(conv_dtype).astype(jnp.float32)

    z = lax.conv_general_dilated(
        xh, w, window_strides=(stride, stride),
        padding=[(padding, padding), (padding, padding)],
        dimension_numbers=("NCHW", "OIHW", "NCHW"))

    m2 = z.mean(axis=(0, 2, 3))
    v2 = z.var(axis=(0, 2, 3))
    zh = (z - m2[None, :, None, None]) / jnp.sqrt(v2 + EPS)[None, :, None, None]
    zh = zh * g2[None, :, None, None] + b2[None, :, None, None]
    return jnp.maximum(zh, 0.0)


# ----------------------------- main ------------------------------

if __name__ == "__main__":
    in_channels, out_channels = 4, 8
    kernel_size, stride, padding = 3, 1, 1
    N, H, W = 2, 16, 16

    key = jax.random.PRNGKey(0)
    kx, kw, kg1, kb1, kg2, kb2 = jax.random.split(key, 6)

    x = jax.random.normal(kx, (N, in_channels, H, W), dtype=jnp.float32)
    params = {
        "conv_w": jax.random.normal(
            kw, (out_channels, in_channels, kernel_size, kernel_size), jnp.float32) * 0.1,
        # PyTorch defaults are gamma=1, beta=0; use nontrivial deterministic values to
        # exercise both affine paths.
        "bn1_gamma": 1.0 + 0.1 * jax.random.normal(kg1, (in_channels,), jnp.float32),
        "bn1_beta": 0.1 * jax.random.normal(kb1, (in_channels,), jnp.float32),
        "bn2_gamma": 1.0 + 0.1 * jax.random.normal(kg2, (out_channels,), jnp.float32),
        "bn2_beta": 0.1 * jax.random.normal(kb2, (out_channels,), jnp.float32),
    }

    out = cnn_block_forward(x, params, stride=stride, padding=padding)
    out = jax.block_until_ready(out)

    # Tight check against a reference that applies the same bf16 rounding to the MXU operands.
    ref_bf16 = cnn_block_reference(x, params, stride=stride, padding=padding,
                                   conv_dtype=jnp.bfloat16)
    # Loose check against the pure-f32 PyTorch-semantics reference (bf16 operand tolerance).
    ref_f32 = cnn_block_reference(x, params, stride=stride, padding=padding)

    assert out.shape == ref_f32.shape, (out.shape, ref_f32.shape)
    assert jnp.allclose(out, ref_bf16, atol=5e-3, rtol=5e-3), \
        float(jnp.max(jnp.abs(out - ref_bf16)))
    assert jnp.allclose(out, ref_f32, atol=5e-2, rtol=5e-2), \
        float(jnp.max(jnp.abs(out - ref_f32)))

    print("KERNEL_OK")
</pallas_src>

<mosaic_0001>
module attributes {stable_mosaic.version = 11 : i64} {
  func.func @_bn_stats_kernel(%arg0: i32, %arg1: memref<1x16x64xf32, #tpu.memory_space<vmem>>, %arg2: memref<1x1x64xf32, #tpu.memory_space<vmem>>, %arg3: memref<1x1x64xf32, #tpu.memory_space<vmem>>) attributes {dimension_semantics = [#tpu.dimension_semantics<parallel>], iteration_bounds = array<i64: 2>, scalar_prefetch = 0 : i64, scratch_operands = 0 : i64, tpu.core_type = #tpu.core_type<tc>, window_params = [{transform_indices = @transform_0, window_bounds = array<i64: 1, 16, 64>}, {transform_indices = @transform_1, window_bounds = array<i64: 1, 1, 64>}, {transform_indices = @transform_2, window_bounds = array<i64: 1, 1, 64>}]} {
    %c0 = arith.constant 0 : index
    %c0_0 = arith.constant 0 : index
    %c0_1 = arith.constant 0 : index
    %0 = vector.load %arg1[%c0, %c0_0, %c0_1] : memref<1x16x64xf32, #tpu.memory_space<vmem>>, vector<1x16x64xf32>
    %1 = vector.shape_cast %0 : vector<1x16x64xf32> to vector<16x64xf32>
    %cst = arith.constant dense<0.000000e+00> : vector<64xf32>
    %2 = vector.multi_reduction <add>, %1, %cst [0] : vector<16x64xf32> to vector<64xf32>
    %3 = vector.shape_cast %2 : vector<64xf32> to vector<1x64xf32>
    %c0_2 = arith.constant 0 : index
    %c0_3 = arith.constant 0 : index
    %c0_4 = arith.constant 0 : index
    %4 = vector.load %arg2[%c0_2, %c0_3, %c0_4] : memref<1x1x64xf32, #tpu.memory_space<vmem>>, vector<1x1x64xf32>
    %5 = vector.shape_cast %4 : vector<1x1x64xf32> to vector<1x64xf32>
    %6 = vector.shape_cast %3 : vector<1x64xf32> to vector<1x1x64xf32>
    tpu.vector_store %arg2[%c0_2, %c0_3, %c0_4], %6 {strides = array<i32>} : memref<1x1x64xf32, #tpu.memory_space<vmem>>, vector<1x1x64xf32>,
    %7 = arith.mulf %1, %1 : vector<16x64xf32>
    %cst_5 = arith.constant dense<0.000000e+00> : vector<64xf32>
    %8 = vector.multi_reduction <add>, %7, %cst_5 [0] : vector<16x64xf32> to vector<64xf32>
    %9 = vector.shape_cast %8 : vector<64xf32> to vector<1x64xf32>
    %c0_6 = arith.constant 0 : index
    %c0_7 = arith.constant 0 : index
    %c0_8 = arith.constant 0 : index
    %10 = vector.load %arg3[%c0_6, %c0_7, %c0_8] : memref<1x1x64xf32, #tpu.memory_space<vmem>>, vector<1x1x64xf32>
    %11 = vector.shape_cast %10 : vector<1x1x64xf32> to vector<1x64xf32>
    %12 = vector.shape_cast %9 : vector<1x64xf32> to vector<1x1x64xf32>
    tpu.vector_store %arg3[%c0_6, %c0_7, %c0_8], %12 {strides = array<i32>} : memref<1x1x64xf32, #tpu.memory_space<vmem>>, vector<1x1x64xf32>,
    return
  }
  func.func @transform_0(%arg0: i32) -> (i32, i32, i32) {
    %c0_i32 = arith.constant 0 : i32
    %c0_i32_0 = arith.constant 0 : i32
    %c0_i32_1 = arith.constant 0 : i32
    return %arg0, %c0_i32, %c0_i32_0 : i32, i32, i32
  }
  func.func @transform_1(%arg0: i32) -> (i32, i32, i32) {
    %c0_i32 = arith.constant 0 : i32
    %c0_i32_0 = arith.constant 0 : i32
    %c0_i32_1 = arith.constant 0 : i32
    return %arg0, %c0_i32, %c0_i32_0 : i32, i32, i32
  }
  func.func @transform_2(%arg0: i32) -> (i32, i32, i32) {
    %c0_i32 = arith.constant 0 : i32
    %c0_i32_0 = arith.constant 0 : i32
    %c0_i32_1 = arith.constant 0 : i32
    return %arg0, %c0_i32, %c0_i32_0 : i32, i32, i32
  }
}

</mosaic_0001>

<bundles_post_ra>
// kernel: tpu_custom_call.1
= control target key start
LH: loop header
LB: loop body
LE: loop exit
PB: predicated region body
PF: predicated region fallthrough
CT: control target
= control target key end

     0   :  { %8 = vsyncpa [#allocation3], 0  ;;  %s734_s0 = inlined_call_operand.hbm [shape: f32[2,16,64], index: 0, kind: input, shape index: {}]   ;;  %s735_s1 = inlined_call_operand.hbm [shape: f32[2,1,64], index: 1, kind: output, shape index: {0}]   ;;  %s736_s2 = inlined_call_operand.hbm [shape: f32[2,1,64], index: 2, kind: output, shape index: {1}]  }
   0x1   :  { %10 = vsyncpa [#allocation3 + $0x1], 0 }
   0x2   :  { %11 = vsyncpa [#allocation4], 0 }
   0x3   :  { %13 = vsyncpa [#allocation4 + $0x1], 0 }
   0x4   :  { %14 = vsyncpa [#allocation7], 0 }
   0x5   :  { %16 = vsyncpa [#allocation7 + $0x1], 0  ;;  %s537_s9 = smov 0   ;;  %s539_s10 = smov 0  }
   0x6   :  { %s541_s11 = smov 0   ;;  %s543_s12 = smov 0  }
   0x7 LB: > { %s558_s13 = sadd.s32 4294967295, %s515_s12   ;;  %s321_s14 = sadd.s32 4294967294, %s515_s12   ;;  %s515_s12 = sphi %s543_s12, %s749_s12   ;;  %s511_s11 = sphi %s541_s11, %s748_s11   ;;  %s507_s10 = sphi %s539_s10, %s747_s10   ;;  %s503_s9 = sphi %s537_s9, %s746_s9  }
   0x8   : > { %s562_s15 = sadd.s32 1, %s515_s12   ;;  %s29_s16 = sadd.s32 1, %s511_s11 }
   0x9   : > { %s26_s17 = ssub.s32 %s515_s12, %s562_s15  ;;  %p36_p0 = scmp.ne.s32.totalorder %s511_s11, %s507_s10 }
   0xa   : > { %p27_p1 = scmp.eq.s32.totalorder %s26_s17, 0  ;;  %p37_p2 = scmp.eq.s32.totalorder %s515_s12, 0 }
   0xb   : > { %p42_p3 = scmp.ne.s32.totalorder %s507_s10, %s503_s9  ;;  %p43_p4 = scmp.eq.s32.totalorder %s558_s13, 0 }
   0xc   : > { %s574_s18 = scalar_select %p27_p1, %s511_s11, %s29_s16  }
   0xd   : > { %p576_p5 = por %p37_p2, %p36_p0  ;;  %p580_p6 = por %p43_p4, %p42_p3 }
   0xe   : > { %p66_p7 = scmp.eq.s32.totalorder %s558_s13, 1  ;;  %p72_p8 = scmp.eq.s32.totalorder %s321_s14, 1 }
   0xf   : > { %p351_p10 = scmp.lt.s32.totalorder %s515_s12, 2  ;;  %s118_s23 = sand.u32 1, %s511_s11  }
  0x10   : > { %p587_p11 = por %p66_p7, %p36_p0  ;;  %p591_p12 = por %p72_p8, %p42_p3 }
  0x11   : > { %s333_s24 = sshll.u32 %s515_s12, 8  ;;  %s324_s25 = sshll.u32 %s118_s23, 4 }
  0x12   : > { %s740_s21 = scalar_select %p587_p11, 1, 0 }
  0x13   : > { %s741_s22 = scalar_select %p591_p12, 1, 0 }
  0x14   : > { %s600_s28 = scalar_lea.hbm %s734_s0, %s333_s24  ;;  %s122_s29 = scalar_lea.vmem [#allocation2], %s324_s25 }
  0x15   : > { %s129_s30 = sshll.u32 %s122_s29, 4  ;;  %p604_p13 = pnand %p351_p10, %p576_p5  ;;  %s608_s30 = int_to_ptr.vmem [resolvable:$true] %s129_s30 }
  0x16   : > { %s610_s4 = scalar_lea.sflag [#allocation3], %s118_s23  ;;  %s387_s5 = scalar_lea.hbm %s600_s28, 256 }
  0x17   : > { %p388_p0 = scmp.ne.s32.totalorder %s600_s28, %s387_s5  ;;  %p389_p1 = pneg %p604_p13 }
  0x18   : > { %s392_s8 = scalar_lea.hbm %s734_s0, 512  ;;  %p393_p4 = scmp.lt.u32.totalorder %s600_s28, %s734_s0 }
  0x19   : > { %p390_p2 = pnand %p389_p1, %p388_p0  ;;  %p394_p5 = scmp.lt.u32.totalorder %s392_s8, %s387_s5 }
  0x1a   : > { %p396_p8 = scmp.lt.u32.totalorder %s387_s5, %s600_s28 }
  0x1b   : > { %p391_p3 = pneg %p390_p2  ;;  %p395_p7 = por %p394_p5, %p393_p4 }
  0x1d   : > { %p397_p10 = por %p396_p8, %p395_p7 }
  0x1f   : > { %p398_p9 = pnand %p397_p10, %p391_p3 }
  0x21   : > { %401 = shalt.err (!%p398_p9)
}
  0x22   : > { %s402_s17 = scalar_lea.vmem %s608_s30, 256  ;;  %s517_s19 = smov [#allocation2]  }
  0x23   : > { %p403_p0 = scmp.ne.s32.totalorder %s608_s30, %s402_s17  ;;  %s407_s23 = sshll.u32 %s517_s19, 4  ;;  %s408_s23 = int_to_ptr.vmem [resolvable:$false] %s407_s23 }
  0x24   : > { %s409_s24 = scalar_lea.vmem %s408_s23, 512  ;;  %p410_p11 = scmp.lt.s32.totalorder %s608_s30, %s408_s23 }
  0x25   : > { %p405_p2 = pnand %p403_p0, %p389_p1  ;;  %p411_p4 = scmp.lt.s32.totalorder %s409_s24, %s402_s17 }
  0x27   : > { %p406_p12 = pneg %p405_p2  ;;  %p412_p5 = por %p411_p4, %p410_p11 }
  0x29   : > { %p413_p7 = pnand %p412_p5, %p406_p12 }
  0x2b   : > { %416 = shalt.err (!%p413_p7)
}
  0x2c   : > { %s518_s25 = smov 128   ;;  %s519_s26 = smov 8  }
  0x2d   : > { %343 = dma.hbm_to_vmem [thread:$0]  (!%p604_p13), %s600_s28, 256, %s608_s30, %s610_s4, %s518_s25, %s518_s25, %s519_s26  }
  0x2e   : > { %p327_p9 = scmp.ge.s32.totalorder %s515_s12, 1  ;;  %p137_p1 = scmp.lt.s32.totalorder %s515_s12, 3 }
  0x30   : > { %p138_p3 = pnand %p327_p9, %p137_p1 }
  0x31   : > { %s641_s27 = sand.u32 (!%p138_p3), 1, %s507_s10  }
  0x32   : > { %141 = sbr.rel (%p138_p3) target bundleno = 111 (0x6f), region = 24  ;;  %s328_s29 = sshll.u32 (!%p138_p3), %s641_s27, 4 }
  0x33   : > { %s144_s5 = scalar_lea.sflag (!%p138_p3), [#allocation3], %s641_s27  ;;  %s147_s6 = scalar_lea.vmem (!%p138_p3), [#allocation2], %s328_s29 }
  0x39   : > { %490 = dma.done.wait (%p580_p6), %s144_s5, 256  }
  0x3a   : > { %492 = vsyncadd (%p580_p6), %s144_s5, 4294967040  ;;  %vm173_vm0 = vcmask 523264   ;;  %v171_v0 = vld [vmem:[%s147_s6] sm:$0xff]  ;;  %v172_v1 = vld [vmem:[%s147_s6 + $0x8] sm:$0xff]  ;;  %s164_s20 = scalar_lea.vmem [#allocation5], %s641_s27  ;;  %s329_s30 = sshll.u32 %s558_s13, 4 }
  0x3b   : > { %v174_v2 = vsel %vm173_vm0, %v171_v0, 0.0  ;;  %v175_v3 = vsel %vm173_vm0, %v172_v1, 0.0  ;;  %v185_v4 = vmul.f32 %v171_v0, %v171_v0  ;;  %v186_v5 = vmul.f32 %v172_v1, %v172_v1  ;;  %s214_s28 = sshll.u32 %s164_s20, 4  ;;  %s170_s3 = scalar_lea.vmem [#allocation6], %s641_s27  ;;  %s654_s28 = int_to_ptr.vmem [resolvable:$true] %s214_s28 }
  0x3c   : > { %v176_v6 = vadd.f32 %v175_v3, %v174_v2  ;;  %s227_s4 = sshll.u32 %s170_s3, 4  ;;  %vm183_vm1 = vcmask 516096   ;;  %s659_s14 = scalar_lea.hbm %s735_s1, %s329_s30  ;;  %s661_s4 = int_to_ptr.vmem [resolvable:$true] %s227_s4 }
  0x3d   : > { %v187_v7 = vsel %vm173_vm0, %v185_v4, 0.0  ;;  %v188_v8 = vsel %vm173_vm0, %v186_v5, 0.0  ;;  %s667_s17 = scalar_lea.hbm %s736_s2, %s329_s30  ;;  %s198_s19 = scalar_lea.sflag [#allocation4], %s641_s27 }
  0x3e   : > { %v177_v9 = vrot.slane %v176_v6, 4  ;;  %v189_v10 = vadd.f32 %v188_v8, %v187_v7  ;;  %s417_s23 = scalar_lea.vmem %s654_s28, 16  ;;  %p743_p11 = scmp.ne.s32.totalorder %s740_s21, 0 }
  0x3f   : > { %p418_p6 = scmp.ne.s32.totalorder %s654_s28, %s417_s23  ;;  %s520_s24 = smov [#allocation5]  }
  0x40   : > { %v178_v11 = vadd.f32 %v177_v9, %v176_v6  ;;  %v190_v12 = vrot.slane %v189_v10, 4  ;;  %s421_s25 = sshll.u32 %s520_s24, 4  ;;  %s422_s25 = int_to_ptr.vmem [resolvable:$false] %s421_s25 }
  0x41   : > { %p419_p12 = pnand %p418_p6, %p743_p11  ;;  %s423_s26 = scalar_lea.vmem %s422_s25, 32 }
  0x42   : > { %v179_v13 = vrot.slane %v178_v11, 2  ;;  %v191_v14 = vadd.f32 %v190_v12, %v189_v10  ;;  %p424_p8 = scmp.lt.s32.totalorder %s654_s28, %s422_s25  ;;  %p425_p10 = scmp.lt.s32.totalorder %s423_s26, %s417_s23 }
  0x43   : > { %p420_p13 = pneg %p419_p12 }
  0x44   : > { %v180_v15 = vadd.f32 %v179_v13, %v178_v11  ;;  %v192_v16 = vrot.slane %v191_v14, 2  ;;  %p426_p0 = por %p425_p10, %p424_p8 }
  0x46   : > { %v181_v17 = vrot.slane %v180_v15, 1  ;;  %v193_v18 = vadd.f32 %v192_v16, %v191_v14  ;;  %p427_p2 = pnand %p426_p0, %p420_p13 }
  0x48   : > { %v182_v19 = vadd.f32 %v181_v17, %v180_v15  ;;  %v194_v20 = vrot.slane %v193_v18, 1 }
  0x4a   : > { %184 = vst.msk [vmem:[%s164_s20] sm:$0x1] %vm183_vm1, %v182_v19  ;;  %v195_v21 = vadd.f32 %v194_v20, %v193_v18 }
  0x4b   : > { %430 = shalt.err (!%p427_p2)
}
  0x4c   : > { %s431_s29 = scalar_lea.hbm %s659_s14, 16  ;;  %s435_s20 = scalar_lea.hbm %s735_s1, 32 }
  0x4d   : > { %p432_p4 = scmp.ne.s32.totalorder %s659_s14, %s431_s29  ;;  %p436_p9 = scmp.lt.u32.totalorder %s659_s14, %s735_s1 }
  0x4e   : > { %p437_p1 = scmp.lt.u32.totalorder %s435_s20, %s431_s29  ;;  %p439_p6 = scmp.lt.u32.totalorder %s431_s29, %s659_s14 }
  0x4f   : > { %p433_p5 = pnand %p432_p4, %p743_p11 }
  0x50   : > { %p438_p3 = por %p437_p1, %p436_p9 }
  0x51   : > { %p434_p7 = pneg %p433_p5 }
  0x52   : > { %p440_p12 = por %p439_p6, %p438_p3 }
  0x54   : > { %p441_p13 = pnand %p440_p12, %p434_p7 }
  0x56   : > { %444 = shalt.err (!%p441_p13)
}
  0x57   : > { %336 = dma.vmem_to_hbm [thread:$0]  (%p743_p11), %s654_s28, 16, %s659_s14, %s198_s19   ;;  %196 = vst.msk [vmem:[%s170_s3] sm:$0x1] %vm183_vm1, %v195_v21 }
  0x58   : > { %s202_s8 = scalar_lea.sflag [#allocation7], %s641_s27  ;;  %s445_s13 = scalar_lea.vmem %s661_s4, 16 }
  0x59   : > { %p446_p8 = scmp.ne.s32.totalorder %s661_s4, %s445_s13  ;;  %s521_s16 = smov [#allocation6]  }
  0x5a   : > { %s449_s23 = sshll.u32 %s521_s16, 4  ;;  %s450_s23 = int_to_ptr.vmem [resolvable:$false] %s449_s23 }
  0x5b   : > { %p447_p10 = pnand %p446_p8, %p743_p11  ;;  %s451_s24 = scalar_lea.vmem %s450_s23, 32 }
  0x5c   : > { %p452_p2 = scmp.lt.s32.totalorder %s661_s4, %s450_s23  ;;  %p453_p4 = scmp.lt.s32.totalorder %s451_s24, %s445_s13 }
  0x5d   : > { %p448_p0 = pneg %p447_p10 }
  0x5e   : > { %p454_p5 = por %p453_p4, %p452_p2 }
  0x60   : > { %p455_p7 = pnand %p454_p5, %p448_p0 }
  0x62   : > { %458 = shalt.err (!%p455_p7)
}
  0x63   : > { %s459_s27 = scalar_lea.hbm %s667_s17, 16  ;;  %s463_s14 = scalar_lea.hbm %s736_s2, 32 }
  0x64   : > { %p460_p9 = scmp.ne.s32.totalorder %s667_s17, %s459_s27  ;;  %p464_p6 = scmp.lt.u32.totalorder %s667_s17, %s736_s2 }
  0x65   : > { %p465_p12 = scmp.lt.u32.totalorder %s463_s14, %s459_s27  ;;  %p467_p8 = scmp.lt.u32.totalorder %s459_s27, %s667_s17 }
  0x66   : > { %p461_p1 = pnand %p460_p9, %p743_p11 }
  0x67   : > { %p466_p13 = por %p465_p12, %p464_p6 }
  0x68   : > { %p462_p3 = pneg %p461_p1 }
  0x69   : > { %p468_p10 = por %p467_p8, %p466_p13 }
  0x6b   : > { %p469_p0 = pnand %p468_p10, %p462_p3 }
  0x6d   : > { %472 = shalt.err (!%p469_p0)
}
  0x6e   : > { %337 = dma.vmem_to_hbm [thread:$0]  (%p743_p11), %s661_s4, 16, %s667_s17, %s202_s8  }
  0x6f PF: > { %s239_s26 = sand.u32 1, %s503_s9   ;;  %p744_p2 = scmp.ne.s32.totalorder %s741_s22, 0 }
  0x70   : > { %p745_p4 = scmp.ge.s32.totalorder %s515_s12, 2  ;;  %s240_s29 = scalar_lea.sflag [#allocation4], %s239_s26 }
  0x72   : > { %p345_p5 = pnand %p745_p4, %p744_p2 }
  0x74   : > { %494 = dma.done.wait (!%p345_p5), %s240_s29, 16  }
  0x75   : > { %496 = vsyncadd (!%p345_p5), %s240_s29, 4294967280  ;;  %s248_s5 = scalar_lea.sflag [#allocation7], %s239_s26 }
  0x76   : > { %498 = dma.done.wait (!%p345_p5), %s248_s5, 16  }
  0x77   : > { %500 = vsyncadd (!%p345_p5), %s248_s5, 4294967280  ;;  %p19_p11 = scmp.ge.s32.totalorder %s562_s15, 4   ;;  %s746_s9 = smov %s507_s10 }
  0x78   : > { %s747_s10 = smov %s511_s11  ;;  %s748_s11 = smov %s574_s18 }
  0x79   : > { %s749_s12 = smov %s562_s15  ;;  %21 = sbr.rel (!%p19_p11) target bundleno = 7 (0x7), region = 86 }
  0x80   :  { %252 = vsyncpa [#allocation3], 1 }
  0x81   :  { %254 = vsyncpa [#allocation3 + $0x1], 1 }
  0x82   :  { %255 = vsyncpa [#allocation4], 1 }
  0x83   :  { %257 = vsyncpa [#allocation4 + $0x1], 1 }
  0x84   :  { %258 = vsyncpa [#allocation7], 1 }
  0x85   :  { %260 = vsyncpa [#allocation7 + $0x1], 1 }

</bundles_post_ra>
